<compile_context>
chip_gen: v5e
topology: v5e:2x2
jax: 0.10.0
libtpu: 0.0.40
codegen_flags: <defaults>
</compile_context>

<pallas_src>
import numpy as np
import jax
import jax.numpy as jnp
from jax import lax
from jax.experimental import pallas as pl
from jax.experimental.pallas import tpu as pltpu

# ---- problem configuration (small, consistent with the module) ----
B = 2             # batch
L = 8             # sequence length (len_q = len_k = len_v)
N_HEAD = 4
D_HID = 32        # d_hid ; d_q = d_k = d_v = d_hid (required by the module's shapes)
D_HEAD = D_HID // N_HEAD
TEMPERATURE = float(D_HID) ** 0.5    # module passes d_k == d_hid -> sqrt(d_hid)
LN_EPS = 1e-6
BIG_NEG = 1e9

BL = B * L                 # 16 token rows
BHL = B * N_HEAD * L       # 64 (batch, head, key) combinations = score columns
LANES = 128
SCOL0 = 32                 # score columns occupy lanes 32:96
X_ROWS = BL + 128          # 144-row input slab (16 token rows + 128-row kv block)

# ---- row offsets inside the packed constant slab (all blocks are 128 lanes wide) ----
R_WQ = 0          # Wq / temperature : rows 0:32   -> proj lanes 0:32
R_WK = 128        # Wk               : rows 32:64  -> proj lanes 0:32
R_WV = 256        # Wv               : rows 64:96  -> proj lanes 0:32
R_WFC = 384       # Wfc              : rows 0:32   -> lanes 0:32
R_HM = 512        # (128,128) per-head feature mask for the expanded K/V operands
R_SEG = 640       # (128,128) block-diagonal ones: segment (per (b,h)) softmax sums
R_INV = 768       # (16,128)  1 where a score column is invalid for that query row
R_QM = 784        # (1,128)   1 on lanes 0:32
R_G1, R_B1, R_G2, R_B2 = 785, 786, 787, 788
C_ROWS = 792      # padded to a multiple of 8


def pack_constants(params):
    """Pack weights, LayerNorm vectors and all structural masks into one
    lane-dense (C_ROWS, 128) f32 operand.  Called once, outside the hot jit."""
    wq, wk, wv, wfc, g1, b1, g2, b2 = (np.asarray(p, np.float32) for p in params)
    c = np.zeros((C_ROWS, LANES), np.float32)

    c[R_WQ:R_WQ + D_HID, 0:D_HID] = wq / TEMPERATURE          # 1/temp folded in
    c[R_WK + D_HID:R_WK + 2 * D_HID, 0:D_HID] = wk            # k features live on lanes 32:64
    c[R_WV + 2 * D_HID:R_WV + 3 * D_HID, 0:D_HID] = wv        # v features live on lanes 64:96
    c[R_WFC:R_WFC + D_HID, 0:D_HID] = wfc

    # score column SCOL0 + r  <->  (b, h, j) with r = (b*N_HEAD + h)*L + j
    for r in range(BHL):
        h = (r // L) % N_HEAD
        c[R_HM + SCOL0 + r, h * D_HEAD:(h + 1) * D_HEAD] = 1.0
        for r2 in range(BHL):
            if r // L == r2 // L:                              # same (batch, head) segment
                c[R_SEG + SCOL0 + r, SCOL0 + r2] = 1.0

    inv = np.ones((BL, LANES), np.float32)
    for t in range(BL):
        b = t // L
        inv[t, SCOL0 + b * N_HEAD * L:SCOL0 + (b + 1) * N_HEAD * L] = 0.0
    c[R_INV:R_INV + BL, :] = inv

    c[R_QM, 0:D_HID] = 1.0
    c[R_G1, 0:D_HID] = g1.reshape(-1)
    c[R_B1, 0:D_HID] = b1.reshape(-1)
    c[R_G2, 0:D_HID] = g2.reshape(-1)
    c[R_B2, 0:D_HID] = b2.reshape(-1)
    return jnp.asarray(c)


def mha_kernel(x_ref, c_ref, o_ref):
    f32 = jnp.float32

    # ---- packed constants (single lane-dense operand, sublane-range loads only) ----
    w_q = c_ref[R_WQ:R_WQ + 128, :]
    w_k = c_ref[R_WK:R_WK + 128, :]
    w_v = c_ref[R_WV:R_WV + 128, :]
    w_fc = c_ref[R_WFC:R_WFC + 128, :]
    hm = c_ref[R_HM:R_HM + 128, :]
    seg = c_ref[R_SEG:R_SEG + 128, :]
    inv = c_ref[R_INV:R_INV + BL, :]
    qm = c_ref[R_QM:R_QM + 1, :]
    g1 = c_ref[R_G1:R_G1 + 1, :]
    b1 = c_ref[R_B1:R_B1 + 1, :]
    g2 = c_ref[R_G2:R_G2 + 1, :]
    b2 = c_ref[R_B2:R_B2 + 1, :]

    x_tok = x_ref[0:BL, :]            # (16,128)  [q | 0 | 0 | 0]
    x_rep = x_ref[BL:X_ROWS, :]       # (128,128) replicated [0 | k | v | 0] on rows 32:96

    # ---- LayerNorm(q): only lanes 0:32 are live, everything else stays exactly 0 ----
    mu1 = jnp.sum(x_tok, axis=-1, keepdims=True) * (1.0 / D_HID)
    d1 = (x_tok - mu1) * qm
    var1 = jnp.sum(d1 * d1, axis=-1, keepdims=True) * (1.0 / D_HID)
    xln = d1 * lax.rsqrt(var1 + LN_EPS) * g1 + b1              # gamma/beta zero-extended

    # ---- projections (MXU); 1/temperature already folded into w_q ----
    qs = jnp.dot(xln, w_q, preferred_element_type=f32)         # (16,128)  q-proj on lanes 0:32
    kp = jnp.dot(x_rep, w_k, preferred_element_type=f32)       # (128,128) k-proj on lanes 0:32
    vp = jnp.dot(x_rep, w_v, preferred_element_type=f32)       # (128,128) v-proj on lanes 0:32
    bk = kp * hm                                               # head-masked K operand
    vx = vp * hm                                               # head-masked V operand

    # ---- scores + segment-local softmax (score columns live on lanes 32:96) ----
    s = lax.dot_general(qs, bk, (((1,), (1,)), ((), ())),
                        preferred_element_type=f32)            # (16,128)
    s = s - BIG_NEG * inv                                      # kill cross-batch / padding columns
    # NOTE: the shift is the row max across all heads; mathematically identical to the
    # per-head softmax and safe for non-adversarial per-head score spreads (< ~80).
    m = jnp.max(s, axis=-1, keepdims=True)
    e = jnp.exp(s - m)                                         # invalid columns underflow to 0
    den = jnp.dot(e, seg, preferred_element_type=f32) + inv + 1e-30
    r = pl.reciprocal(den, approx=True)                        # EUP
    r = r * (2.0 - den * r)                                    # one Newton step (~1e-6 rel err)
    a = e * r                                                  # softmax on cols 32:96, 0 elsewhere

    # ---- attention output, residual, LayerNorm, FC, residual ----
    o_att = jnp.dot(a, vx, preferred_element_type=f32)         # heads concatenated on lanes 0:32
    q2 = o_att + x_tok                                         # + residual (original q)

    mu2 = jnp.sum(q2, axis=-1, keepdims=True) * (1.0 / D_HID)
    d2 = (q2 - mu2) * qm
    var2 = jnp.sum(d2 * d2, axis=-1, keepdims=True) * (1.0 / D_HID)
    qn2 = d2 * lax.rsqrt(var2 + LN_EPS) * g2 + b2

    fc = jnp.dot(qn2, w_fc, preferred_element_type=f32)        # lanes 0:32
    out_w = fc + q2                                            # module output on lanes 0:32

    # ---- compact the attention map onto lanes 32:64 (batch-1 rows shift left by 32) ----
    a_shift = jnp.concatenate([a[:, D_HID:], jnp.zeros((BL, D_HID), f32)], axis=-1)
    row_is_b0 = lax.broadcasted_iota(jnp.int32, (BL, LANES), 0) < L
    a_cmp = jnp.where(row_is_b0, a, a_shift)

    o_ref[...] = out_w + a_cmp                                 # single lane-dense store


@jax.jit
def multi_head_attention(q, k, v, cpack):
    """q, k, v: (B, L, D_HID); cpack: packed constants from pack_constants()."""
    qf = q.reshape(BL, D_HID)
    kf = k.reshape(BL, D_HID)
    vf = v.reshape(BL, D_HID)
    zcol = jnp.zeros((BL, D_HID), jnp.float32)

    q_rows = jnp.concatenate([qf, jnp.zeros((BL, LANES - D_HID), jnp.float32)], axis=1)
    kv_tok = jnp.concatenate([zcol, kf, vf, zcol], axis=1)                 # (16,128) [0|k|v|0]
    kv_rep = jnp.broadcast_to(kv_tok.reshape(B, 1, L, LANES),
                              (B, N_HEAD, L, LANES)).reshape(BHL, LANES)   # row (b*4+h)*8+j
    x_big = jnp.concatenate(
        [q_rows,
         jnp.zeros((SCOL0, LANES), jnp.float32),
         kv_rep,
         jnp.zeros((128 - SCOL0 - BHL, LANES), jnp.float32)], axis=0)      # (144,128)

    vmem = pl.BlockSpec(memory_space=pltpu.MemorySpace.VMEM)
    slab = pl.pallas_call(
        mha_kernel,
        out_shape=jax.ShapeDtypeStruct((BL, LANES), jnp.float32),
        in_specs=[vmem, vmem],
        out_specs=vmem,
    )(x_big, cpack)

    out = slab[:, 0:D_HID].reshape(B, L, D_HID)
    attn = slab[:, D_HID:2 * D_HID].reshape(B, L, N_HEAD, L).transpose(0, 2, 1, 3)
    return out, attn


# ---------------- pure-JAX reference of the PyTorch forward (eval, mask=None) ----------------
def _layernorm(x, gamma, beta):
    mu = jnp.mean(x, axis=-1, keepdims=True)
    var = jnp.mean((x - mu) ** 2, axis=-1, keepdims=True)
    return (x - mu) * lax.rsqrt(var + LN_EPS) * gamma + beta


def reference(q, k, v, params):
    wq, wk, wv, wfc, g1, b1, g2, b2 = params
    residual = q
    qn = _layernorm(q, g1[0], b1[0])
    qp = (qn @ wq).reshape(B, L, N_HEAD, D_HEAD).transpose(0, 2, 1, 3)
    kp = (k @ wk).reshape(B, L, N_HEAD, D_HEAD).transpose(0, 2, 1, 3)
    vp = (v @ wv).reshape(B, L, N_HEAD, D_HEAD).transpose(0, 2, 1, 3)
    scores = jnp.einsum("bhqd,bhkd->bhqk", qp / TEMPERATURE, kp)
    attn = jax.nn.softmax(scores, axis=-1)
    o = jnp.einsum("bhqk,bhkd->bhqd", attn, vp)
    o = o.transpose(0, 2, 1, 3).reshape(B, L, D_HID)
    o = o + residual
    residual = o
    o = _layernorm(o, g2[0], b2[0]) @ wfc + residual
    return o, attn


if __name__ == "__main__":
    key = jax.random.PRNGKey(0)
    ks = jax.random.split(key, 8)

    q = jax.random.normal(ks[0], (B, L, D_HID), dtype=jnp.float32)
    k = jax.random.normal(ks[1], (B, L, D_HID), dtype=jnp.float32)
    v = jax.random.normal(ks[2], (B, L, D_HID), dtype=jnp.float32)

    scale = 1.0 / (D_HID ** 0.5)
    wq = jax.random.normal(ks[3], (D_HID, D_HID), dtype=jnp.float32) * scale
    wk = jax.random.normal(ks[4], (D_HID, D_HID), dtype=jnp.float32) * scale
    wv = jax.random.normal(ks[5], (D_HID, D_HID), dtype=jnp.float32) * scale
    wfc = jax.random.normal(ks[6], (D_HID, D_HID), dtype=jnp.float32) * scale
    g1 = jnp.ones((1, D_HID), dtype=jnp.float32)
    b1 = jnp.zeros((1, D_HID), dtype=jnp.float32)
    g2 = jnp.ones((1, D_HID), dtype=jnp.float32)
    b2 = jnp.zeros((1, D_HID), dtype=jnp.float32)
    params = (wq, wk, wv, wfc, g1, b1, g2, b2)

    cpack = pack_constants(params)          # built once, outside the hot path

    out, attn = multi_head_attention(q, k, v, cpack)
    jax.block_until_ready((out, attn))

    out_ref, attn_ref = reference(q, k, v, params)
    assert jnp.allclose(out, out_ref, atol=1e-4, rtol=1e-4), "output mismatch"
    assert jnp.allclose(attn, attn_ref, atol=1e-4, rtol=1e-4), "attn mismatch"

    print("KERNEL_OK")
</pallas_src>

<mosaic_0001>
module attributes {stable_mosaic.version = 11 : i64} {
  func.func @mha_kernel(%arg0: memref<144x128xf32, #tpu.memory_space<vmem>>, %arg1: memref<792x128xf32, #tpu.memory_space<vmem>>, %arg2: memref<16x128xf32, #tpu.memory_space<vmem>>) attributes {dimension_semantics = [], scalar_prefetch = 0 : i64, scratch_operands = 0 : i64, tpu.core_type = #tpu.core_type<tc>} {
    %c0 = arith.constant 0 : index
    %c0_0 = arith.constant 0 : index
    %0 = vector.load %arg1[%c0, %c0_0] : memref<792x128xf32, #tpu.memory_space<vmem>>, vector<128x128xf32>
    %c128 = arith.constant 128 : index
    %c0_1 = arith.constant 0 : index
    %1 = vector.load %arg1[%c128, %c0_1] : memref<792x128xf32, #tpu.memory_space<vmem>>, vector<128x128xf32>
    %c256 = arith.constant 256 : index
    %c0_2 = arith.constant 0 : index
    %2 = vector.load %arg1[%c256, %c0_2] : memref<792x128xf32, #tpu.memory_space<vmem>>, vector<128x128xf32>
    %c384 = arith.constant 384 : index
    %c0_3 = arith.constant 0 : index
    %3 = vector.load %arg1[%c384, %c0_3] : memref<792x128xf32, #tpu.memory_space<vmem>>, vector<128x128xf32>
    %c512 = arith.constant 512 : index
    %c0_4 = arith.constant 0 : index
    %4 = vector.load %arg1[%c512, %c0_4] : memref<792x128xf32, #tpu.memory_space<vmem>>, vector<128x128xf32>
    %c640 = arith.constant 640 : index
    %c0_5 = arith.constant 0 : index
    %5 = vector.load %arg1[%c640, %c0_5] : memref<792x128xf32, #tpu.memory_space<vmem>>, vector<128x128xf32>
    %c768 = arith.constant 768 : index
    %c0_6 = arith.constant 0 : index
    %6 = vector.load %arg1[%c768, %c0_6] : memref<792x128xf32, #tpu.memory_space<vmem>>, vector<16x128xf32>
    %c784 = arith.constant 784 : index
    %c0_7 = arith.constant 0 : index
    %7 = vector.load %arg1[%c784, %c0_7] : memref<792x128xf32, #tpu.memory_space<vmem>>, vector<1x128xf32>
    %c785 = arith.constant 785 : index
    %c0_8 = arith.constant 0 : index
    %8 = vector.load %arg1[%c785, %c0_8] : memref<792x128xf32, #tpu.memory_space<vmem>>, vector<1x128xf32>
    %c786 = arith.constant 786 : index
    %c0_9 = arith.constant 0 : index
    %9 = vector.load %arg1[%c786, %c0_9] : memref<792x128xf32, #tpu.memory_space<vmem>>, vector<1x128xf32>
    %c787 = arith.constant 787 : index
    %c0_10 = arith.constant 0 : index
    %10 = vector.load %arg1[%c787, %c0_10] : memref<792x128xf32, #tpu.memory_space<vmem>>, vector<1x128xf32>
    %c788 = arith.constant 788 : index
    %c0_11 = arith.constant 0 : index
    %11 = vector.load %arg1[%c788, %c0_11] : memref<792x128xf32, #tpu.memory_space<vmem>>, vector<1x128xf32>
    %c0_12 = arith.constant 0 : index
    %c0_13 = arith.constant 0 : index
    %12 = vector.load %arg0[%c0_12, %c0_13] : memref<144x128xf32, #tpu.memory_space<vmem>>, vector<16x128xf32>
    %c16 = arith.constant 16 : index
    %c0_14 = arith.constant 0 : index
    %13 = vector.load %arg0[%c16, %c0_14] : memref<144x128xf32, #tpu.memory_space<vmem>>, vector<128x128xf32>
    %cst = arith.constant dense<0.000000e+00> : vector<16xf32>
    %14 = vector.multi_reduction <add>, %12, %cst [1] : vector<16x128xf32> to vector<16xf32>
    %15 = vector.shape_cast %14 : vector<16xf32> to vector<16x1xf32>
    %cst_15 = arith.constant 3.125000e-02 : f32
    %16 = vector.broadcast %cst_15 : f32 to vector<16x1xf32>
    %17 = arith.mulf %15, %16 : vector<16x1xf32>
    %18 = vector.broadcast %17 : vector<16x1xf32> to vector<16x128xf32>
    %19 = arith.subf %12, %18 : vector<16x128xf32>
    %20 = vector.broadcast %7 : vector<1x128xf32> to vector<16x128xf32>
    %21 = arith.mulf %19, %20 : vector<16x128xf32>
    %22 = arith.mulf %21, %21 : vector<16x128xf32>
    %cst_16 = arith.constant dense<0.000000e+00> : vector<16xf32>
    %23 = vector.multi_reduction <add>, %22, %cst_16 [1] : vector<16x128xf32> to vector<16xf32>
    %24 = vector.shape_cast %23 : vector<16xf32> to vector<16x1xf32>
    %cst_17 = arith.constant 3.125000e-02 : f32
    %25 = vector.broadcast %cst_17 : f32 to vector<16x1xf32>
    %26 = arith.mulf %24, %25 : vector<16x1xf32>
    %cst_18 = arith.constant 9.99999997E-7 : f32
    %27 = vector.broadcast %cst_18 : f32 to vector<16x1xf32>
    %28 = arith.addf %26, %27 : vector<16x1xf32>
    %29 = math.rsqrt %28 : vector<16x1xf32>
    %30 = vector.broadcast %29 : vector<16x1xf32> to vector<16x128xf32>
    %31 = arith.mulf %21, %30 : vector<16x128xf32>
    %32 = vector.broadcast %8 : vector<1x128xf32> to vector<16x128xf32>
    %33 = arith.mulf %31, %32 : vector<16x128xf32>
    %34 = vector.broadcast %9 : vector<1x128xf32> to vector<16x128xf32>
    %35 = arith.addf %33, %34 : vector<16x128xf32>
    %cst_19 = arith.constant dense<0.000000e+00> : vector<16x128xf32>
    %36 = tpu.matmul %35, %0, %cst_19 {dimension_numbers = #tpu.dot_dimension_numbers<[1], [0], [0], [1], [0, 0, 1, 1], [], []>} : vector<16x128xf32>, vector<128x128xf32>, vector<16x128xf32> -> vector<16x128xf32>
    %cst_20 = arith.constant dense<0.000000e+00> : vector<128x128xf32>
    %37 = tpu.matmul %13, %1, %cst_20 {dimension_numbers = #tpu.dot_dimension_numbers<[1], [0], [0], [1], [0, 0, 1, 1], [], []>} : vector<128x128xf32>, vector<128x128xf32>, vector<128x128xf32> -> vector<128x128xf32>
    %cst_21 = arith.constant dense<0.000000e+00> : vector<128x128xf32>
    %38 = tpu.matmul %13, %2, %cst_21 {dimension_numbers = #tpu.dot_dimension_numbers<[1], [0], [0], [1], [0, 0, 1, 1], [], []>} : vector<128x128xf32>, vector<128x128xf32>, vector<128x128xf32> -> vector<128x128xf32>
    %39 = arith.mulf %37, %4 : vector<128x128xf32>
    %40 = arith.mulf %38, %4 : vector<128x128xf32>
    %cst_22 = arith.constant dense<0.000000e+00> : vector<16x128xf32>
    %41 = tpu.matmul %36, %39, %cst_22 {dimension_numbers = #tpu.dot_dimension_numbers<[1], [1], [0], [0], [0, 0, 1, 0], [], []>} : vector<16x128xf32>, vector<128x128xf32>, vector<16x128xf32> -> vector<16x128xf32>
    %cst_23 = arith.constant 1.000000e+09 : f32
    %42 = vector.broadcast %cst_23 : f32 to vector<16x128xf32>
    %43 = arith.mulf %42, %6 : vector<16x128xf32>
    %44 = arith.subf %41, %43 : vector<16x128xf32>
    %cst_24 = arith.constant dense<0xFF800000> : vector<16xf32>
    %45 = vector.multi_reduction <maximumf>, %44, %cst_24 [1] : vector<16x128xf32> to vector<16xf32>
    %46 = vector.shape_cast %45 : vector<16xf32> to vector<16x1xf32>
    %47 = vector.broadcast %46 : vector<16x1xf32> to vector<16x128xf32>
    %48 = arith.subf %44, %47 : vector<16x128xf32>
    %49 = math.exp %48 : vector<16x128xf32>
    %cst_25 = arith.constant dense<0.000000e+00> : vector<16x128xf32>
    %50 = tpu.matmul %49, %5, %cst_25 {dimension_numbers = #tpu.dot_dimension_numbers<[1], [0], [0], [1], [0, 0, 1, 1], [], []>} : vector<16x128xf32>, vector<128x128xf32>, vector<16x128xf32> -> vector<16x128xf32>
    %51 = arith.addf %50, %6 : vector<16x128xf32>
    %cst_26 = arith.constant 1.000000e-30 : f32
    %52 = vector.broadcast %cst_26 : f32 to vector<16x128xf32>
    %53 = arith.addf %51, %52 : vector<16x128xf32>
    %54 = tpu.reciprocal %53 {approx = true} : vector<16x128xf32> -> vector<16x128xf32>
    %55 = arith.mulf %53, %54 : vector<16x128xf32>
    %cst_27 = arith.constant 2.000000e+00 : f32
    %56 = vector.broadcast %cst_27 : f32 to vector<16x128xf32>
    %57 = arith.subf %56, %55 : vector<16x128xf32>
    %58 = arith.mulf %54, %57 : vector<16x128xf32>
    %59 = arith.mulf %49, %58 : vector<16x128xf32>
    %cst_28 = arith.constant dense<0.000000e+00> : vector<16x128xf32>
    %60 = tpu.matmul %59, %40, %cst_28 {dimension_numbers = #tpu.dot_dimension_numbers<[1], [0], [0], [1], [0, 0, 1, 1], [], []>} : vector<16x128xf32>, vector<128x128xf32>, vector<16x128xf32> -> vector<16x128xf32>
    %61 = arith.addf %60, %12 : vector<16x128xf32>
    %cst_29 = arith.constant dense<0.000000e+00> : vector<16xf32>
    %62 = vector.multi_reduction <add>, %61, %cst_29 [1] : vector<16x128xf32> to vector<16xf32>
    %63 = vector.shape_cast %62 : vector<16xf32> to vector<16x1xf32>
    %cst_30 = arith.constant 3.125000e-02 : f32
    %64 = vector.broadcast %cst_30 : f32 to vector<16x1xf32>
    %65 = arith.mulf %63, %64 : vector<16x1xf32>
    %66 = vector.broadcast %65 : vector<16x1xf32> to vector<16x128xf32>
    %67 = arith.subf %61, %66 : vector<16x128xf32>
    %68 = vector.broadcast %7 : vector<1x128xf32> to vector<16x128xf32>
    %69 = arith.mulf %67, %68 : vector<16x128xf32>
    %70 = arith.mulf %69, %69 : vector<16x128xf32>
    %cst_31 = arith.constant dense<0.000000e+00> : vector<16xf32>
    %71 = vector.multi_reduction <add>, %70, %cst_31 [1] : vector<16x128xf32> to vector<16xf32>
    %72 = vector.shape_cast %71 : vector<16xf32> to vector<16x1xf32>
    %cst_32 = arith.constant 3.125000e-02 : f32
    %73 = vector.broadcast %cst_32 : f32 to vector<16x1xf32>
    %74 = arith.mulf %72, %73 : vector<16x1xf32>
    %cst_33 = arith.constant 9.99999997E-7 : f32
    %75 = vector.broadcast %cst_33 : f32 to vector<16x1xf32>
    %76 = arith.addf %74, %75 : vector<16x1xf32>
    %77 = math.rsqrt %76 : vector<16x1xf32>
    %78 = vector.broadcast %77 : vector<16x1xf32> to vector<16x128xf32>
    %79 = arith.mulf %69, %78 : vector<16x128xf32>
    %80 = vector.broadcast %10 : vector<1x128xf32> to vector<16x128xf32>
    %81 = arith.mulf %79, %80 : vector<16x128xf32>
    %82 = vector.broadcast %11 : vector<1x128xf32> to vector<16x128xf32>
    %83 = arith.addf %81, %82 : vector<16x128xf32>
    %cst_34 = arith.constant dense<0.000000e+00> : vector<16x128xf32>
    %84 = tpu.matmul %83, %3, %cst_34 {dimension_numbers = #tpu.dot_dimension_numbers<[1], [0], [0], [1], [0, 0, 1, 1], [], []>} : vector<16x128xf32>, vector<128x128xf32>, vector<16x128xf32> -> vector<16x128xf32>
    %85 = arith.addf %84, %61 : vector<16x128xf32>
    %86 = vector.extract_strided_slice %59 {offsets = [0, 32], sizes = [16, 96], strides = [1, 1]} : vector<16x128xf32> to vector<16x96xf32>
    %cst_35 = arith.constant 0.000000e+00 : f32
    %87 = vector.broadcast %cst_35 : f32 to vector<16x32xf32>
    %88 = tpu.concatenate %86, %87 in 1 : vector<16x96xf32>, vector<16x32xf32> -> vector<16x128xf32>
    %89 = tpu.iota {dimensions = array<i32: 0>} : vector<16x128xi32>
    %c8_i32 = arith.constant 8 : i32
    %90 = vector.broadcast %c8_i32 : i32 to vector<16x128xi32>
    %91 = arith.cmpi slt, %89, %90 : vector<16x128xi32>
    %92 = arith.select %91, %59, %88 : vector<16x128xi1>, vector<16x128xf32>
    %93 = arith.addf %85, %92 : vector<16x128xf32>
    %c0_36 = arith.constant 0 : index
    %c0_37 = arith.constant 0 : index
    %94 = vector.load %arg2[%c0_36, %c0_37] : memref<16x128xf32, #tpu.memory_space<vmem>>, vector<16x128xf32>
    tpu.vector_store %arg2[%c0_36, %c0_37], %93 {strides = array<i32>} : memref<16x128xf32, #tpu.memory_space<vmem>>, vector<16x128xf32>,
    return
  }
}

</mosaic_0001>

<bundles_post_ra>
// kernel: multi_head_attention.1
= control target key start
LH: loop header
LB: loop body
LE: loop exit
PB: predicated region body
PF: predicated region fallthrough
CT: control target
= control target key end

     0   :  { %7 = vsyncpa [#allocation3], 0  ;;  %s626_s12 = smov [#allocation2]   ;;  %s627_s14 = smov 128   ;;  %s951_s0 = inlined_call_operand.vmem [shape: f32[144,128], index: 0, kind: input, shape index: {}]   ;;  %s952_s1 = inlined_call_operand.hbm [shape: f32[792,128], index: 1, kind: input, shape index: {}]   ;;  %s953_s2 = inlined_call_operand.vmem [shape: f32[16,128], index: 2, kind: output, shape index: {}]  }
   0x1   :  { %s14_s11 = sshll.u32 %s952_s1, 4  ;;  %s16_s13 = sshll.u32 %s626_s12, 4  ;;  %s15_s11 = int_to_ptr.hbm [resolvable:$true] %s14_s11  ;;  %s17_s13 = int_to_ptr.vmem [resolvable:$true] %s16_s13 }
   0x2   :  { %s628_s15 = smov 8  }
   0x3   :  { %22 = dma.hbm_to_vmem [thread:$0]  %s15_s11, 12672, %s17_s13, [#allocation3], %s627_s14, %s627_s14, %s628_s15  }
   0x4   :  { %624 = dma.done.wait [#allocation3], 12672  }
   0x5   :  { %625 = vsyncadd [#allocation3], 4294954624  ;;  %v651_v0 = vld [vmem:[%s951_s0] sm:$0xff]  ;;  %v58_v1 = vld [vmem:[#allocation2 + $0xf8] sm:$0xff]  ;;  %vm556_vm12 = vcmask 785408  }
   0x6   :  { %v57_v2 = vld [vmem:[#allocation2 + $0xf0] sm:$0xff]  ;;  %148 = vadd.xlane.f32.xlu0 %v651_v0  ;;  %220 = vmatpush.msra.mxu1 %v58_v1  ;;  %v56_v3 = vld [vmem:[#allocation2 + $0xe8] sm:$0xff]  ;;  %v55_v4 = vld [vmem:[#allocation2 + $0xe0] sm:$0xff] }
   0x7   :  { %v657_v5 = vld [vmem:[%s951_s0 + $0x8] sm:$0xff]  ;;  %v54_v6 = vld [vmem:[#allocation2 + $0xd8] sm:$0xff]  ;;  %v53_v7 = vld [vmem:[#allocation2 + $0xd0] sm:$0xff] }
   0x8   :  { %221 = vmatpush.msra.mxu1 %v57_v2  ;;  %v52_v8 = vld [vmem:[#allocation2 + $0xc8] sm:$0xff]  ;;  %v51_v9 = vld [vmem:[#allocation2 + $0xc0] sm:$0xff]  ;;  %v50_v10 = vld [vmem:[#allocation2 + $0xb8] sm:$0xff] }
   0x9   :  { %v49_v11 = vld [vmem:[#allocation2 + $0xb0] sm:$0xff]  ;;  %v48_v12 = vld [vmem:[#allocation2 + $0xa8] sm:$0xff]  ;;  %v47_v13 = vld [vmem:[#allocation2 + $0xa0] sm:$0xff] }
   0xa   :  { %222 = vmatpush.msra.mxu1 %v56_v3  ;;  %v46_v14 = vld [vmem:[#allocation2 + $0x98] sm:$0xff]  ;;  %v45_v15 = vld [vmem:[#allocation2 + $0x90] sm:$0xff]  ;;  %v44_v16 = vld [vmem:[#allocation2 + $0x88] sm:$0xff] }
   0xb   :  { %v43_v17 = vld [vmem:[#allocation2 + $0x80] sm:$0xff]  ;;  %v663_v18 = vld [vmem:[%s951_s0 + $0x10] sm:$0xff]  ;;  %v669_v19 = vld [vmem:[%s951_s0 + $0x18] sm:$0xff] }
   0xc   :  { %223 = vmatpush.msra.mxu1 %v55_v4  ;;  %v675_v20 = vld [vmem:[%s951_s0 + $0x20] sm:$0xff]  ;;  %v681_v21 = vld [vmem:[%s951_s0 + $0x28] sm:$0xff]  ;;  %v687_v22 = vld [vmem:[%s951_s0 + $0x30] sm:$0xff] }
   0xd   :  { %v693_v23 = vld [vmem:[%s951_s0 + $0x38] sm:$0xff]  ;;  %v699_v24 = vld [vmem:[%s951_s0 + $0x40] sm:$0xff]  ;;  %v705_v25 = vld [vmem:[%s951_s0 + $0x48] sm:$0xff] }
   0xe   :  { %150 = vadd.xlane.f32.xlu0 %v657_v5  ;;  %224 = vmatpush.msra.mxu1 %v54_v6  ;;  %v711_v26 = vld [vmem:[%s951_s0 + $0x50] sm:$0xff]  ;;  %v717_v27 = vld [vmem:[%s951_s0 + $0x58] sm:$0xff]  ;;  %v723_v28 = vld [vmem:[%s951_s0 + $0x60] sm:$0xff] }
   0xf   :  { %v729_v31 = vld [vmem:[%s951_s0 + $0x68] sm:$0xff]  ;;  %v731_v32 = vld [vmem:[#allocation2 + $0x310] ss:$0 sm:$0xff]  ;;  %v755_v42 = vld [vmem:[%s951_s0 + $0x78] sm:$0xff] }
  0x10   :  { %225 = vmatpush.msra.mxu1 %v53_v7  ;;  %v743_v38 = vld [vmem:[%s951_s0 + $0x70] sm:$0xff]  ;;  %v761_v43 = vld [vmem:[%s951_s0 + $0x80] sm:$0xff]  ;;  %v767_v44 = vld [vmem:[%s951_s0 + $0x88] sm:$0xff]  ;;  %s629_s0 = smov 96  }
  0x11   :  { %v42_v52 = vld [vmem:[#allocation2 + $0x78] sm:$0xff]  ;;  %v41_v53 = vld [vmem:[#allocation2 + $0x70] sm:$0xff]  ;;  %v40_v54 = vld [vmem:[#allocation2 + $0x68] sm:$0xff] }
  0x12   :  { %226 = vmatpush.msra.mxu1 %v52_v8  ;;  %197 = vmatpush.msra.mxu0 %v42_v52  ;;  %v39_v55 = vld [vmem:[#allocation2 + $0x60] sm:$0xff]  ;;  %v38_v57 = vld [vmem:[#allocation2 + $0x58] sm:$0xff]  ;;  %v37_v58 = vld [vmem:[#allocation2 + $0x50] sm:$0xff] }
  0x13   :  { %v36_v59 = vld [vmem:[#allocation2 + $0x48] sm:$0xff]  ;;  %v35_v60 = vld [vmem:[#allocation2 + $0x40] sm:$0xff]  ;;  %v34_v62 = vld [vmem:[#allocation2 + $0x38] sm:$0xff] }
  0x14   :  { %227 = vmatpush.msra.mxu1 %v51_v9  ;;  %198 = vmatpush.msra.mxu0 %v41_v53  ;;  %v33_v63 = vld [vmem:[#allocation2 + $0x30] sm:$0xff]  ;;  %v32_v1 = vld [vmem:[#allocation2 + $0x28] sm:$0xff]  ;;  %v31_v2 = vld [vmem:[#allocation2 + $0x20] sm:$0xff] }
  0x15   :  { %v30_v4 = vld [vmem:[#allocation2 + $0x18] sm:$0xff]  ;;  %v29_v6 = vld [vmem:[#allocation2 + $0x10] sm:$0xff]  ;;  %v28_v7 = vld [vmem:[#allocation2 + $0x8] sm:$0xff] }
  0x16   :  { %228 = vmatpush.msra.mxu1 %v50_v10  ;;  %199 = vmatpush.msra.mxu0 %v40_v54  ;;  %v27_v8 = vld [vmem:[#allocation2] sm:$0xff]  ;;  %v580_v53 = vld [vmem:[#allocation2 + $0x311] ss:$0 sm:$0xff] }
  0x18   :  { %229 = vmatpush.msra.mxu1 %v49_v11  ;;  %200 = vmatpush.msra.mxu0 %v39_v55 }
  0x1a   :  { %230 = vmatpush.msra.mxu1 %v48_v12  ;;  %201 = vmatpush.msra.mxu0 %v38_v57 }
  0x1c   :  { %231 = vmatpush.msra.mxu1 %v47_v13  ;;  %202 = vmatpush.msra.mxu0 %v37_v58  ;;  %v581_v58 = vld [vmem:[#allocation2 + $0x312] ss:$0 sm:$0xff] }
  0x1e   :  { %232 = vmatpush.msra.mxu1 %v46_v14  ;;  %203 = vmatpush.msra.mxu0 %v36_v59 }
  0x20   :  { %233 = vmatpush.msra.mxu1 %v45_v15  ;;  %204 = vmatpush.msra.mxu0 %v35_v60 }
  0x22   :  { %234 = vmatpush.msra.mxu1 %v44_v16  ;;  %205 = vmatpush.msra.mxu0 %v34_v62 }
  0x24   :  { %235 = vmatpush.msra.mxu1 %v43_v17  ;;  %206 = vmatpush.msra.mxu0 %v33_v63 }
  0x25   :  { %236 = vmatmul.f32.vlgmr.msra.gmra.mxu1 %v663_v18 }
  0x26   :  { %207 = vmatpush.msra.mxu0 %v32_v1 }
  0x28   :  { %208 = vmatpush.msra.mxu0 %v31_v2 }
  0x2a   :  { %209 = vmatpush.msra.mxu0 %v30_v4 }
  0x2c   :  { %210 = vmatpush.msra.mxu0 %v29_v6 }
  0x2d   :  { %239 = vmatmul.f32.gmra.mxu1 %v669_v19 }
  0x2e   :  { %211 = vmatpush.msra.mxu0 %v28_v7 }
  0x30   :  { %212 = vmatpush.msra.mxu0 %v27_v8 }
  0x35   :  { %242 = vmatmul.f32.gmra.mxu1 %v675_v20 }
  0x3d   :  { %245 = vmatmul.f32.gmra.mxu1 %v681_v21 }
  0x45   :  { %248 = vmatmul.f32.gmra.mxu1 %v687_v22 }
  0x4d   :  { %251 = vmatmul.f32.gmra.mxu1 %v693_v23 }
  0x55   :  { %254 = vmatmul.f32.gmra.mxu1 %v699_v24 }
  0x5d   :  { %257 = vmatmul.f32.gmra.mxu1 %v705_v25 }
  0x65   :  { %260 = vmatmul.f32.gmra.mxu1 %v711_v26 }
  0x6d   :  { %263 = vmatmul.f32.gmra.mxu1 %v717_v27 }
  0x75   :  { %266 = vmatmul.f32.gmra.mxu1 %v723_v28 }
  0x79   :  { %v149_v29 = vpop.xlane.xlu0 %148 }
  0x7a   :  { %v152_v30 = vmul.f32 0.03125, %v149_v29 }
  0x7c   :  { %v154_v33 = vsub.f32 %v651_v0, %v152_v30 }
  0x7d   :  { %269 = vmatmul.f32.gmra.mxu1 %v729_v31 }
  0x7e   :  { %v736_v34 = vmul.f32 %v731_v32, %v154_v33 }
  0x80   :  { %v159_v35 = vmul.f32 %v736_v34, %v736_v34 }
  0x81   :  { %v151_v36 = vpop.xlane.xlu0 %150 }
  0x82   :  { %v153_v37 = vmul.f32 0.03125, %v151_v36  ;;  %161 = vadd.xlane.f32.xlu1 %v159_v35 }
  0x84   :  { %v155_v39 = vsub.f32 %v657_v5, %v153_v37 }
  0x85   :  { %272 = vmatmul.f32.gmra.mxu1 %v743_v38 }
  0x86   :  { %v748_v40 = vmul.f32 %v731_v32, %v155_v39 }
  0x88   :  { %v160_v41 = vmul.f32 %v748_v40, %v748_v40 }
  0x8a   :  { %163 = vadd.xlane.f32.xlu1 %v160_v41 }
  0x8d   :  { %275 = vmatmul.f32.gmra.mxu1 %v755_v42 }
  0x95   :  { %278 = vmatmul.f32.gmra.mxu1 %v761_v43 }
  0x9d   :  { %281 = vmatmul.f32.gmra.mxu1 %v767_v44 }
  0xa2   :  { %v770_v45 = vpop.f32.mrf.mxu1 }
  0xaa   :  { %v772_v46 = vpop.f32.mrf.mxu1 }
  0xb2   :  { %v774_v47 = vpop.f32.mrf.mxu1 }
  0xba   :  { %v776_v48 = vpop.f32.mrf.mxu1 }
  0xc2   :  { %v778_v49 = vpop.f32.mrf.mxu1 }
  0xca   :  { %v780_v50 = vpop.f32.mrf.mxu1 }
  0xd2   :  { %v782_v51 = vpop.f32.mrf.mxu1 }
  0xda   :  { %v784_v56 = vpop.f32.mrf.mxu1 }
  0xe2   :  { %v786_v61 = vpop.f32.mrf.mxu1 }
  0xea   :  { %v788_v3 = vpop.f32.mrf.mxu1 }
  0xf2   :  { %v267_v9 = vpop.f32.mrf.mxu1 }
  0xf5   :  { %v162_v10 = vpop.xlane.xlu1 %161 }
  0xf6   :  { %v165_v11 = vmul.f32 0.03125, %v162_v10  ;;  %v792_v10 = vld [vmem:[#allocation2 + $0x278] sm:$0xff] }
  0xf8   :  { %v167_v12 = vadd.f32 1e-06, %v165_v11  ;;  %v794_v11 = vld [vmem:[#allocation2 + $0x270] sm:$0xff] }
  0xfa   :  { %584 = vrsqrt.f32 %v167_v12  ;;  %v270_v13 = vpop.f32.mrf.mxu1  ;;  %vm175_vm1 = vweird.f32 %v167_v12 }
  0xfd   :  { %v164_v14 = vpop.xlane.xlu1 %163 }
  0xfe   :  { %v166_v15 = vmul.f32 0.03125, %v164_v14 }
 0x100   :  { %v585_v16 = vpop.eup %584  ;;  %v168_v17 = vadd.f32 1e-06, %v166_v15  ;;  %v798_v15 = vld [vmem:[#allocation2 + $0x268] sm:$0xff] }
 0x101   :  { %v170_v29 = vmul.f32 %v585_v16, %v167_v12  ;;  %vm176_vm0 = vweird.f32 %v585_v16 }
 0x102   :  { %586 = vrsqrt.f32 %v168_v17  ;;  %v273_v30 = vpop.f32.mrf.mxu1  ;;  %vm177_vm2 = vmor %vm175_vm1, %vm176_vm0  ;;  %vm185_vm4 = vweird.f32 %v168_v17 }
 0x103   :  { %v171_v33 = vmul.f32 %v585_v16, %v170_v29  ;;  %v804_v29 = vld [vmem:[#allocation2 + $0x258] sm:$0xff] }
 0x105   :  { %v172_v35 = vmul.f32 0.5, %v171_v33  ;;  %v361_v33 = vmul.f32 %v270_v13, %v804_v29 }
 0x107   :  { %v173_v36 = vsub.f32 1.5, %v172_v35  ;;  %v807_v35 = vld [vmem:[#allocation2 + $0x250] sm:$0xff] }
 0x108   :  { %v587_v37 = vpop.eup %586 }
 0x109   :  { %v174_v39 = vmul.f32 %v585_v16, %v173_v36  ;;  %v180_v41 = vmul.f32 %v587_v37, %v168_v17  ;;  %vm186_vm3 = vweird.f32 %v587_v37  ;;  %v801_v17 = vld [vmem:[#allocation2 + $0x260] sm:$0xff]  ;;  %v360_v36 = vmul.f32 %v267_v9, %v807_v35 }
 0x10a   :  { %v276_v52 = vpop.f32.mrf.mxu1  ;;  %vm187_vm5 = vmor %vm185_vm4, %vm186_vm3  ;;  %v71_v9 = vld [vmem:[#allocation2 + $0x160] sm:$0xff] }
 0x10b   :  { %v181_v54 = vmul.f32 %v587_v37, %v180_v41  ;;  %v178_v55 = vsel %vm177_vm2, %v585_v16, %v174_v39  ;;  %v363_v16 = vmul.f32 %v276_v52, %v798_v15  ;;  %v74_v39 = vld [vmem:[#allocation2 + $0x178] sm:$0xff]  ;;  %v73_v52 = vld [vmem:[#allocation2 + $0x170] sm:$0xff] }
 0x10c   :  { %v189_v57 = vmul.f32 %v178_v55, %v736_v34  ;;  %285 = vmatpush.msra.mxu2 %v74_v39  ;;  %v70_v55 = vld [vmem:[#allocation2 + $0x158] sm:$0xff]  ;;  %v119_v39 = vld [vmem:[#allocation2 + $0x2e0] sm:$0xff] }
 0x10d   :  { %v182_v59 = vmul.f32 0.5, %v181_v54  ;;  %v818_v54 = vld [vmem:[#allocation2 + $0x238] sm:$0xff] }
 0x10e   :  { %v192_v60 = vmul.f32 %v580_v53, %v189_v57  ;;  %286 = vmatpush.msra.mxu2 %v73_v52  ;;  %v357_v57 = vmul.f32 %v784_v56, %v818_v54  ;;  %v118_v52 = vld [vmem:[#allocation2 + $0x2d8] sm:$0xff] }
 0x10f   :  { %v183_v62 = vsub.f32 1.5, %v182_v59  ;;  %v68_v59 = vld [vmem:[#allocation2 + $0x148] sm:$0xff] }
 0x110   :  { %v195_v63 = vadd.f32 %v581_v58, %v192_v60  ;;  %v67_v60 = vld [vmem:[#allocation2 + $0x140] sm:$0xff] }
 0x111   :  { %v184_v1 = vmul.f32 %v587_v37, %v183_v62  ;;  %v826_v62 = vld [vmem:[#allocation2 + $0x228] sm:$0xff] }
 0x112   :  { %213 = vmatmul.f32.vlgmr.msra.gmra.mxu0 %v195_v63  ;;  %v279_v2 = vpop.f32.mrf.mxu1  ;;  %v66_v63 = vld [vmem:[#allocation2 + $0x138] sm:$0xff]  ;;  %v355_v56 = vmul.f32 %v780_v50, %v826_v62 }
 0x113   :  { %v188_v4 = vsel %vm187_vm5, %v587_v37, %v184_v1  ;;  %v364_v14 = vmul.f32 %v279_v2, %v794_v11  ;;  %v810_v37 = vld [vmem:[#allocation2 + $0x248] sm:$0xff]  ;;  %v65_v1 = vld [vmem:[#allocation2 + $0x130] sm:$0xff]  ;;  %v830_v2 = vld [vmem:[#allocation2 + $0x220] sm:$0xff] }
 0x114   :  { %v190_v6 = vmul.f32 %v188_v4, %v748_v40  ;;  %v362_v40 = vmul.f32 %v273_v30, %v801_v17  ;;  %v359_v41 = vmul.f32 %v788_v3, %v810_v37  ;;  %v814_v30 = vld [vmem:[#allocation2 + $0x240] sm:$0xff]  ;;  %v69_v3 = vld [vmem:[#allocation2 + $0x150] sm:$0xff]  ;;  %v64_v4 = vld [vmem:[#allocation2 + $0x128] sm:$0xff] }
 0x115   :  { %v358_v13 = vmul.f32 %v786_v61, %v814_v30 }
 0x116   :  { %v193_v7 = vmul.f32 %v580_v53, %v190_v6  ;;  %v72_v53 = vld [vmem:[#allocation2 + $0x168] sm:$0xff]  ;;  %v63_v6 = vld [vmem:[#allocation2 + $0x120] sm:$0xff] }
 0x117   :  { %287 = vmatpush.msra.mxu2 %v72_v53 }
 0x118   :  { %v196_v8 = vadd.f32 %v581_v58, %v193_v7  ;;  %v822_v58 = vld [vmem:[#allocation2 + $0x230] sm:$0xff]  ;;  %v834_v7 = vld [vmem:[#allocation2 + $0x218] sm:$0xff] }
 0x119   :  { %288 = vmatpush.msra.mxu2 %v71_v9  ;;  %v356_v61 = vmul.f32 %v782_v51, %v822_v58  ;;  %v354_v51 = vmul.f32 %v778_v49, %v830_v2  ;;  %v353_v50 = vmul.f32 %v776_v48, %v834_v7  ;;  %v847_v48 = vld [vmem:[#allocation2 + $0x200] sm:$0xff] }
 0x11a   :  { %216 = vmatmul.f32.gmra.mxu0 %v196_v8  ;;  %v282_v34 = vpop.f32.mrf.mxu1  ;;  %v62_v8 = vld [vmem:[#allocation2 + $0x118] sm:$0xff] }
 0x11b   :  { %v365_v12 = vmul.f32 %v282_v34, %v792_v10  ;;  %289 = vmatpush.msra.mxu2 %v70_v55  ;;  %v61_v34 = vld [vmem:[#allocation2 + $0x110] sm:$0xff] }
 0x11d   :  { %382 = vmatpush.xpose.msra.mxu3 %v365_v12  ;;  %290 = vmatpush.msra.mxu2 %v69_v3  ;;  %v838_v12 = vld [vmem:[#allocation2 + $0x210] sm:$0xff]  ;;  %v115_v3 = vld [vmem:[#allocation2 + $0x2c0] sm:$0xff] }
 0x11e   :  { %v352_v49 = vmul.f32 %v774_v47, %v838_v12  ;;  %v120_v47 = vld [vmem:[#allocation2 + $0x2e8] sm:$0xff] }
 0x11f   :  { %291 = vmatpush.msra.mxu2 %v68_v59  ;;  %v114_v59 = vld [vmem:[#allocation2 + $0x2b8] sm:$0xff] }
 0x121   :  { %383 = vmatpush.xpose.msra.mxu3 %v364_v14  ;;  %292 = vmatpush.msra.mxu2 %v67_v60  ;;  %v60_v14 = vld [vmem:[#allocation2 + $0x108] sm:$0xff] }
 0x123   :  { %293 = vmatpush.msra.mxu2 %v66_v63  ;;  %v112_v63 = vld [vmem:[#allocation2 + $0x2a8] sm:$0xff] }
 0x125   :  { %384 = vmatpush.xpose.msra.mxu3 %v363_v16  ;;  %294 = vmatpush.msra.mxu2 %v65_v1  ;;  %v59_v16 = vld [vmem:[#allocation2 + $0x100] sm:$0xff]  ;;  %v110_v1 = vld [vmem:[#allocation2 + $0x298] sm:$0xff] }
 0x127   :  { %295 = vmatpush.msra.mxu2 %v64_v4  ;;  %v109_v4 = vld [vmem:[#allocation2 + $0x290] sm:$0xff] }
 0x129   :  { %385 = vmatpush.xpose.msra.mxu3 %v362_v40  ;;  %296 = vmatpush.msra.mxu2 %v63_v6  ;;  %v842_v40 = vld [vmem:[#allocation2 + $0x208] sm:$0xff] }
 0x12a   :  { %v108_v6 = vld [vmem:[#allocation2 + $0x288] sm:$0xff] }
 0x12b   :  { %297 = vmatpush.msra.mxu2 %v62_v8  ;;  %v107_v8 = vld [vmem:[#allocation2 + $0x280] sm:$0xff] }
 0x12d   :  { %386 = vmatpush.xpose.msra.mxu3 %v361_v33  ;;  %298 = vmatpush.msra.mxu2 %v61_v34  ;;  %v351_v33 = vmul.f32 %v772_v46, %v842_v40 }
 0x12f   :  { %299 = vmatpush.msra.mxu2 %v60_v14 }
 0x131   :  { %387 = vmatpush.xpose.msra.mxu3 %v360_v36  ;;  %300 = vmatpush.msra.mxu2 %v59_v16  ;;  %v350_v36 = vmul.f32 %v770_v45, %v847_v48 }
 0x132   :  { %301 = vmatmul.f32.vlgmr.msra.gmra.mxu2 %v663_v18 }
 0x135   :  { %388 = vmatpush.xpose.msra.mxu3 %v359_v41 }
 0x139   :  { %389 = vmatpush.xpose.msra.mxu3 %v358_v13  ;;  %v117_v13 = vld [vmem:[#allocation2 + $0x2d0] sm:$0xff] }
 0x13a   :  { %304 = vmatmul.f32.gmra.mxu2 %v669_v19 }
 0x13d   :  { %390 = vmatpush.xpose.msra.mxu3 %v357_v57  ;;  %v116_v57 = vld [vmem:[#allocation2 + $0x2c8] sm:$0xff] }
 0x141   :  { %391 = vmatpush.xpose.msra.mxu3 %v356_v61  ;;  %v113_v61 = vld [vmem:[#allocation2 + $0x2b0] sm:$0xff] }
 0x142   :  { %307 = vmatmul.f32.gmra.mxu2 %v675_v20 }
 0x145   :  { %392 = vmatpush.xpose.msra.mxu3 %v355_v56  ;;  %v111_v56 = vld [vmem:[#allocation2 + $0x2a0] sm:$0xff] }
 0x149   :  { %393 = vmatpush.xpose.msra.mxu3 %v354_v51 }
 0x14a   :  { %310 = vmatmul.f32.gmra.mxu2 %v681_v21 }
 0x14d   :  { %394 = vmatpush.xpose.msra.mxu3 %v353_v50 }
 0x151   :  { %395 = vmatpush.xpose.msra.mxu3 %v352_v49 }
 0x152   :  { %313 = vmatmul.f32.gmra.mxu2 %v687_v22 }
 0x155   :  { %396 = vmatpush.xpose.msra.mxu3 %v351_v33 }
 0x159   :  { %397 = vmatpush.xpose.msra.mxu3 %v350_v36 }
 0x15a   :  { %316 = vmatmul.f32.gmra.mxu2 %v693_v23 }
 0x162   :  { %319 = vmatmul.f32.gmra.mxu2 %v699_v24 }
 0x16a   :  { %322 = vmatmul.f32.gmra.mxu2 %v705_v25 }
 0x172   :  { %325 = vmatmul.f32.gmra.mxu2 %v711_v26  ;;  %v880_v26 = vld [vmem:[#allocation2 + $0x300] sm:$0xff] }
 0x17a   :  { %328 = vmatmul.f32.gmra.mxu2 %v717_v27 }
 0x182   :  { %331 = vmatmul.f32.gmra.mxu2 %v723_v28  ;;  %v122_v28 = vld [vmem:[#allocation2 + $0x2f8] sm:$0xff] }
 0x183   :  { %419 = vmatpush.msrb.mxu0 %v122_v28 }
 0x18a   :  { %334 = vmatmul.f32.gmra.mxu2 %v729_v31  ;;  %v121_v31 = vld [vmem:[#allocation2 + $0x2f0] sm:$0xff] }
 0x18b   :  { %420 = vmatpush.msrb.mxu0 %v121_v31 }
 0x18d   :  { %421 = vmatpush.msrb.mxu0 %v120_v47 }
 0x18f   :  { %v214_v18 = vpop.f32.mrf.mxu0  ;;  %422 = vmatpush.msrb.mxu0 %v119_v39 }
 0x190   :  { %398 = vmatmul.f32.vlgmr.msra.gmra.mxu3 %v214_v18 }
 0x191   :  { %423 = vmatpush.msrb.mxu0 %v118_v52 }
 0x192   :  { %337 = vmatmul.f32.gmra.mxu2 %v743_v38  ;;  %v405_v38 = vmul.f32 1e+09, %v880_v26 }
 0x193   :  { %424 = vmatpush.msrb.mxu0 %v117_v13 }
 0x195   :  { %425 = vmatpush.msrb.mxu0 %v116_v57 }
 0x197   :  { %v217_v45 = vpop.f32.mrf.mxu0  ;;  %426 = vmatpush.msrb.mxu0 %v115_v3  ;;  %v90_v3 = vld [vmem:[#allocation2 + $0x1f8] sm:$0xff] }
 0x198   :  { %401 = vmatmul.f32.gmra.mxu3 %v217_v45 }
 0x199   :  { %427 = vmatpush.msrb.mxu0 %v114_v59  ;;  %v89_v59 = vld [vmem:[#allocation2 + $0x1f0] sm:$0xff]  ;;  %525 = vmatpush.msrb.mxu3 %v90_v3 }
 0x19a   :  { %340 = vmatmul.f32.gmra.mxu2 %v755_v42 }
 0x19b   :  { %428 = vmatpush.msrb.mxu0 %v113_v61  ;;  %526 = vmatpush.msrb.mxu3 %v89_v59 }
 0x19d   :  { %429 = vmatpush.msrb.mxu0 %v112_v63 }
 0x19f   :  { %430 = vmatpush.msrb.mxu0 %v111_v56 }
 0x1a1   :  { %431 = vmatpush.msrb.mxu0 %v110_v1 }
 0x1a2   :  { %343 = vmatmul.f32.gmra.mxu2 %v761_v43 }
 0x1a3   :  { %432 = vmatpush.msrb.mxu0 %v109_v4 }
 0x1a5   :  { %433 = vmatpush.msrb.mxu0 %v108_v6  ;;  %v87_v6 = vld [vmem:[#allocation2 + $0x1e0] sm:$0xff] }
 0x1a7   :  { %434 = vmatpush.msrb.mxu0 %v107_v8  ;;  %v86_v8 = vld [vmem:[#allocation2 + $0x1d8] sm:$0xff] }
 0x1aa   :  { %346 = vmatmul.f32.gmra.mxu2 %v767_v44  ;;  %v887_v44 = vld [vmem:[#allocation2 + $0x308] sm:$0xff] }
 0x1ab   :  { %v406_v41 = vmul.f32 1e+09, %v887_v44 }
 0x1b5   :  { %v866_v19 = vpop.f32.mrf.mxu2 }
 0x1bd   :  { %v868_v20 = vpop.f32.mrf.mxu2 }
 0x1c5   :  { %v870_v21 = vpop.f32.mrf.mxu2 }
 0x1cd   :  { %v872_v22 = vpop.f32.mrf.mxu2 }
 0x1d5   :  { %v874_v23 = vpop.f32.mrf.mxu2 }
 0x1dd   :  { %v876_v24 = vpop.f32.mrf.mxu2 }
 0x1e5   :  { %v878_v25 = vpop.f32.mrf.mxu2 }
 0x1ed   :  { %v882_v27 = vpop.f32.mrf.mxu2 }
 0x1f5   :  { %v326_v46 = vpop.f32.mrf.mxu2 }
 0x1fd   :  { %v329_v55 = vpop.f32.mrf.mxu2 }
 0x1fe   :  { %v375_v31 = vmul.f32 %v329_v55, %v810_v37  ;;  %v367_v37 = vmul.f32 %v868_v20, %v842_v40 }
 0x205   :  { %v332_v60 = vpop.f32.mrf.mxu2 }
 0x206   :  { %v376_v28 = vmul.f32 %v332_v60, %v807_v35  ;;  %v368_v35 = vmul.f32 %v870_v21, %v838_v12 }
 0x20d   :  { %v335_v51 = vpop.f32.mrf.mxu2 }
 0x20e   :  { %v377_v45 = vmul.f32 %v335_v51, %v804_v29  ;;  %v369_v29 = vmul.f32 %v872_v22, %v834_v7  ;;  %v88_v51 = vld [vmem:[#allocation2 + $0x1e8] sm:$0xff] }
 0x20f   :  { %527 = vmatpush.msrb.mxu3 %v88_v51 }
 0x211   :  { %528 = vmatpush.msrb.mxu3 %v87_v6 }
 0x213   :  { %v399_v42 = vpop.f32.mrf.mxu3  ;;  %529 = vmatpush.msrb.mxu3 %v86_v8 }
 0x214   :  { %v885_v43 = vsub.f32 %v399_v42, %v405_v38  ;;  %v374_v38 = vmul.f32 %v326_v46, %v814_v30  ;;  %v366_v30 = vmul.f32 %v866_v19, %v847_v48 }
 0x215   :  { %v338_v50 = vpop.f32.mrf.mxu2 }
 0x216   :  { %409 = vmax.xlane.f32.xlu2 %v885_v43  ;;  %v378_v18 = vmul.f32 %v338_v50, %v801_v17  ;;  %v370_v17 = vmul.f32 %v874_v23, %v830_v2  ;;  %v85_v50 = vld [vmem:[#allocation2 + $0x1d0] sm:$0xff] }
 0x217   :  { %530 = vmatpush.msrb.mxu3 %v85_v50 }
 0x21b   :  { %v402_v53 = vpop.f32.mrf.mxu3 }
 0x21c   :  { %v891_v9 = vsub.f32 %v402_v53, %v406_v41 }
 0x21d   :  { %v341_v34 = vpop.f32.mrf.mxu2 }
 0x21e   :  { %411 = vmax.xlane.f32.xlu2 %v891_v9  ;;  %v379_v36 = vmul.f32 %v341_v34, %v798_v15  ;;  %v371_v15 = vmul.f32 %v876_v24, %v826_v62  ;;  %v84_v34 = vld [vmem:[#allocation2 + $0x1c8] sm:$0xff] }
 0x21f   :  { %531 = vmatpush.msrb.mxu3 %v84_v34 }
 0x225   :  { %v344_v14 = vpop.f32.mrf.mxu2 }
 0x226   :  { %v380_v16 = vmul.f32 %v344_v14, %v794_v11  ;;  %v372_v11 = vmul.f32 %v878_v25, %v822_v58  ;;  %v83_v14 = vld [vmem:[#allocation2 + $0x1c0] sm:$0xff] }
 0x227   :  { %532 = vmatpush.msrb.mxu3 %v83_v14 }
 0x22d   :  { %v347_v49 = vpop.f32.mrf.mxu2 }
 0x22e   :  { %v381_v33 = vmul.f32 %v347_v49, %v792_v10  ;;  %v373_v10 = vmul.f32 %v882_v27, %v818_v54  ;;  %v82_v49 = vld [vmem:[#allocation2 + $0x1b8] sm:$0xff] }
 0x22f   :  { %533 = vmatpush.msrb.mxu3 %v82_v49 }
 0x230   :  { %454 = vmatpush.msra.mxu0 %v381_v33  ;;  %v79_v33 = vld [vmem:[#allocation2 + $0x1a0] sm:$0xff] }
 0x232   :  { %455 = vmatpush.msra.mxu0 %v380_v16  ;;  %v80_v16 = vld [vmem:[#allocation2 + $0x1a8] sm:$0xff] }
 0x234   :  { %456 = vmatpush.msra.mxu0 %v379_v36  ;;  %v78_v36 = vld [vmem:[#allocation2 + $0x198] sm:$0xff] }
 0x236   :  { %457 = vmatpush.msra.mxu0 %v378_v18  ;;  %v77_v18 = vld [vmem:[#allocation2 + $0x190] sm:$0xff] }
 0x238   :  { %458 = vmatpush.msra.mxu0 %v377_v45  ;;  %v76_v45 = vld [vmem:[#allocation2 + $0x188] sm:$0xff] }
 0x23a   :  { %459 = vmatpush.msra.mxu0 %v376_v28  ;;  %v75_v28 = vld [vmem:[#allocation2 + $0x180] sm:$0xff] }
 0x23c   :  { %460 = vmatpush.msra.mxu0 %v375_v31 }
 0x23e   :  { %461 = vmatpush.msra.mxu0 %v374_v38 }
 0x240   :  { %462 = vmatpush.msra.mxu0 %v373_v10 }
 0x242   :  { %463 = vmatpush.msra.mxu0 %v372_v11 }
 0x244   :  { %464 = vmatpush.msra.mxu0 %v371_v15 }
 0x246   :  { %465 = vmatpush.msra.mxu0 %v370_v17 }
 0x248   :  { %466 = vmatpush.msra.mxu0 %v369_v29 }
 0x24a   :  { %467 = vmatpush.msra.mxu0 %v368_v35 }
 0x24c   :  { %468 = vmatpush.msra.mxu0 %v367_v37 }
 0x24e   :  { %469 = vmatpush.msra.mxu0 %v366_v30 }
 0x289   :  { %v410_v54 = vpop.xlane.xlu2 %409 }
 0x28a   :  { %v413_v58 = vsub.f32 %v885_v43, %v410_v54 }
 0x28c   :  { %v415_v62 = vmul.f32 1.442695, %v413_v58 }
 0x28e   :  { %588 = vpow2.f32 %v415_v62 }
 0x291   :  { %v412_v2 = vpop.xlane.xlu2 %411 }
 0x292   :  { %v414_v7 = vsub.f32 %v891_v9, %v412_v2 }
 0x294   :  { %v589_v12 = vpop.eup %588  ;;  %v417_v21 = vmul.f32 1.442695, %v414_v7  ;;  %v582_v7 = vld [vmem:[#allocation2 + $0x313] ss:$0 sm:$0xff] }
 0x295   :  { %435 = vmatmul.f32.vlgmr.msrb.gmra.mxu0 %v589_v12 }
 0x296   :  { %590 = vpow2.f32 %v417_v21 }
 0x29c   :  { %v591_v40 = vpop.eup %590 }
 0x29d   :  { %438 = vmatmul.f32.gmra.mxu0 %v591_v40 }
 0x312   :  { %v436_v20 = vpop.f32.mrf.mxu0 }
 0x313   :  { %v437_v48 = vadd.f32 %v436_v20, %v880_v26  ;;  %v583_v20 = vld [vmem:[#allocation2 + $0x314] ss:$0 sm:$0xff] }
 0x315   :  { %v442_v19 = vadd.f32 1e-30, %v437_v48 }
 0x317   :  { %592 = vrcp.f32 %v442_v19 }
 0x31a   :  { %v439_v22 = vpop.f32.mrf.mxu0 }
 0x31b   :  { %v440_v23 = vadd.f32 %v439_v22, %v887_v44 }
 0x31d   :  { %v593_v24 = vpop.eup %592  ;;  %v443_v25 = vadd.f32 1e-30, %v440_v23 }
 0x31e   :  { %v446_v27 = vmul.f32 %v593_v24, %v442_v19 }
 0x31f   :  { %594 = vrcp.f32 %v443_v25 }
 0x320   :  { %v448_v42 = vsub.f32 2.0, %v446_v27 }
 0x322   :  { %v450_v43 = vmul.f32 %v593_v24, %v448_v42 }
 0x324   :  { %v922_v46 = vmul.f32 %v589_v12, %v450_v43 }
 0x325   :  { %v595_v47 = vpop.eup %594 }
 0x326   :  { %v447_v39 = vmul.f32 %v595_v47, %v443_v25  ;;  %470 = vmatmul.f32.vlgmr.msra.gmra.mxu0 %v922_v46 }
 0x328   :  { %v449_v41 = vsub.f32 2.0, %v447_v39 }
 0x32a   :  { %v451_v52 = vmul.f32 %v595_v47, %v449_v41 }
 0x32c   :  { %v453_v26 = vmul.f32 %v591_v40, %v451_v52 }
 0x32e   :  { %473 = vmatmul.f32.gmra.mxu0 %v453_v26 }
 0x3a3   :  { %v471_v53 = vpop.f32.mrf.mxu0 }
 0x3a4   :  { %v926_v13 = vadd.f32 %v471_v53, %v651_v0 }
 0x3a6   :  { %477 = vadd.xlane.f32.xlu0 %v926_v13 }
 0x3ab   :  { %v474_v44 = vpop.f32.mrf.mxu0 }
 0x3ac   :  { %v930_v9 = vadd.f32 %v474_v44, %v657_v5 }
 0x3ae   :  { %479 = vadd.xlane.f32.xlu1 %v930_v9 }
 0x3c7   :  { %552 = vrot.lane.b32.xlu1 %v453_v26, %s629_s0 }
 0x419   :  { %v478_v55 = vpop.xlane.xlu0 %477 }
 0x41a   :  { %v481_v57 = vmul.f32 0.03125, %v478_v55 }
 0x41c   :  { %v483_v61 = vsub.f32 %v926_v13, %v481_v57 }
 0x41e   :  { %v485_v0 = vmul.f32 %v731_v32, %v483_v61 }
 0x420   :  { %v487_v60 = vmul.f32 %v485_v0, %v485_v0 }
 0x421   :  { %v480_v63 = vpop.xlane.xlu1 %479 }
 0x422   :  { %v482_v56 = vmul.f32 0.03125, %v480_v63  ;;  %489 = vadd.xlane.f32.xlu2 %v487_v60 }
 0x424   :  { %v484_v5 = vsub.f32 %v930_v9, %v482_v56 }
 0x426   :  { %v937_v1 = vmul.f32 %v731_v32, %v484_v5  ;;  %v81_v32 = vld [vmem:[#allocation2 + $0x1b0] sm:$0xff] }
 0x427   :  { %534 = vmatpush.msrb.mxu3 %v81_v32 }
 0x428   :  { %v488_v4 = vmul.f32 %v937_v1, %v937_v1 }
 0x429   :  { %535 = vmatpush.msrb.mxu3 %v80_v16 }
 0x42a   :  { %491 = vadd.xlane.f32.xlu0 %v488_v4 }
 0x42b   :  { %536 = vmatpush.msrb.mxu3 %v79_v33 }
 0x42d   :  { %537 = vmatpush.msrb.mxu3 %v78_v36 }
 0x42f   :  { %538 = vmatpush.msrb.mxu3 %v77_v18 }
 0x431   :  { %539 = vmatpush.msrb.mxu3 %v76_v45 }
 0x433   :  { %540 = vmatpush.msrb.mxu3 %v75_v28 }
 0x439   :  { %v553_v52 = vpop.permute.xlu1 %552 }
 0x43a   :  { %v558_v44 = vsel %vm556_vm12, %v553_v52, 0.0 }
 0x495   :  { %v490_v31 = vpop.xlane.xlu2 %489 }
 0x496   :  { %v493_v38 = vmul.f32 0.03125, %v490_v31 }
 0x498   :  { %v495_v10 = vadd.f32 1e-06, %v493_v38 }
 0x49a   :  { %596 = vrsqrt.f32 %v495_v10  ;;  %vm503_vm7 = vweird.f32 %v495_v10 }
 0x49d   :  { %v492_v11 = vpop.xlane.xlu0 %491 }
 0x49e   :  { %v494_v15 = vmul.f32 0.03125, %v492_v11 }
 0x4a0   :  { %v597_v17 = vpop.eup %596  ;;  %v496_v29 = vadd.f32 1e-06, %v494_v15 }
 0x4a1   :  { %v498_v35 = vmul.f32 %v597_v17, %v495_v10  ;;  %vm504_vm6 = vweird.f32 %v597_v17 }
 0x4a2   :  { %598 = vrsqrt.f32 %v496_v29  ;;  %vm505_vm8 = vmor %vm503_vm7, %vm504_vm6  ;;  %vm513_vm10 = vweird.f32 %v496_v29 }
 0x4a3   :  { %v499_v37 = vmul.f32 %v597_v17, %v498_v35 }
 0x4a5   :  { %v500_v30 = vmul.f32 0.5, %v499_v37 }
 0x4a7   :  { %v501_v54 = vsub.f32 1.5, %v500_v30 }
 0x4a8   :  { %v599_v58 = vpop.eup %598 }
 0x4a9   :  { %v502_v62 = vmul.f32 %v597_v17, %v501_v54  ;;  %v508_v2 = vmul.f32 %v599_v58, %v496_v29  ;;  %vm514_vm9 = vweird.f32 %v599_v58 }
 0x4aa   :  { %vm515_vm11 = vmor %vm513_vm10, %vm514_vm9 }
 0x4ab   :  { %v506_v12 = vsel %vm505_vm8, %v597_v17, %v502_v62  ;;  %v509_v21 = vmul.f32 %v599_v58, %v508_v2 }
 0x4ac   :  { %v517_v40 = vmul.f32 %v506_v12, %v485_v0 }
 0x4ad   :  { %v510_v48 = vmul.f32 0.5, %v509_v21 }
 0x4ae   :  { %v520_v19 = vmul.f32 %v582_v7, %v517_v40 }
 0x4af   :  { %v511_v22 = vsub.f32 1.5, %v510_v48 }
 0x4b0   :  { %v523_v23 = vadd.f32 %v583_v20, %v520_v19 }
 0x4b1   :  { %v512_v24 = vmul.f32 %v599_v58, %v511_v22 }
 0x4b2   :  { %541 = vmatmul.f32.vlgmr.msrb.gmra.mxu3 %v523_v23 }
 0x4b3   :  { %v516_v25 = vsel %vm515_vm11, %v599_v58, %v512_v24 }
 0x4b4   :  { %v518_v27 = vmul.f32 %v516_v25, %v937_v1 }
 0x4b6   :  { %v521_v42 = vmul.f32 %v582_v7, %v518_v27 }
 0x4b8   :  { %v524_v43 = vadd.f32 %v583_v20, %v521_v42 }
 0x4ba   :  { %544 = vmatmul.f32.gmra.mxu3 %v524_v43 }
 0x535   :  { %v542_v47 = vpop.f32.mrf.mxu3 }
 0x536   :  { %v543_v39 = vadd.f32 %v542_v47, %v926_v13 }
 0x538   :  { %v566_v41 = vadd.f32 %v543_v39, %v922_v46 }
 0x53a   :  { %568 = vst [vmem:[%s953_s2] sm:$0xff] %v566_v41 }
 0x53d   :  { %v545_v26 = vpop.f32.mrf.mxu3 }
 0x53e   :  { %v546_v53 = vadd.f32 %v545_v26, %v930_v9 }
 0x540   :  { %v567_v55 = vadd.f32 %v558_v44, %v546_v53 }
 0x542   :  { %569 = vst [vmem:[%s953_s2 + $0x8] sm:$0xff] %v567_v55 }
 0x543   :  { %574 = vsyncpa [#allocation3], 1 }

</bundles_post_ra>
